<compile_context>
chip_gen: v7x
topology: tpu7x:2x2x1
jax: 0.10.0
libtpu: 0.0.40
codegen_flags: <defaults>
</compile_context>

<pallas_src>
import jax
import jax.numpy as jnp
from jax.experimental import pallas as pl
from jax.experimental.pallas import tpu as pltpu

IGNORE_INDEX = -100.0  # standard HF ignore index


def _round_up(x, m):
    return ((x + m - 1) // m) * m


# ----------------------------------------------------------------------------
# Fused kernel: both verifier heads + masked-MSE partial sums, tiled over M.
#   acc    = h_tile @ [w_out | w_proc]                       (TILE_M, 2)  f32 acc
#   scores = acc * [og, pg] + [ob*sum(w_out), pb*sum(w_proc)] (folded affine)
#   psum   = per-tile [sum((s_o-l_o)^2), sum((s_p-l_p)^2)] over valid labels
# ----------------------------------------------------------------------------
def _biverifier_kernel(affine_ref, h_ref, w_ref, lab_ref, scores_ref, psum_ref):
    # Single fused matmul for both heads: h tile goes through the MXU once.
    acc = jnp.dot(h_ref[...], w_ref[...],
                  preferred_element_type=jnp.float32)          # (TILE_M, 2)
    # Folded affine transform (post-matmul, essentially free on (TILE_M, 2)).
    # affine row 0 = [outcome_gain, process_gain]
    # affine row 1 = [outcome_bias * sum(w_out), process_bias * sum(w_proc)]
    scores = acc * affine_ref[0:1, :] + affine_ref[1:2, :]
    # NOTE: dropout (p=0.2) is identity in eval/inference mode; omitted here.
    scores_ref[...] = scores

    # Fused masked-MSE partial sums for this tile (both heads at once).
    lab = lab_ref[...]                                          # (TILE_M, 2) f32
    d = jnp.where(lab != IGNORE_INDEX, scores - lab, 0.0)
    psum_ref[...] = jnp.sum(d * d, axis=0, keepdims=True).reshape(1, 1, 2)


def biverifier_heads_and_loss(hidden_2d, w_cat, affine, labels_2d, *, tile_m=None):
    """Fused verifier heads + masked-MSE partial sums.

    hidden_2d : (M, D)      backbone last hidden states (bf16 or f32)
    w_cat     : (D, 2)      [w_outcome | w_process], same dtype as hidden
    affine    : (2, 2) f32  row0=[out_gain, proc_gain],
                            row1=[out_bias*sum(w_out), proc_bias*sum(w_proc)]
    labels_2d : (M, 2) f32  [outcome_labels | process_labels], IGNORE_INDEX masked

    Returns: scores (M, 2) f32, per-tile loss partial sums (num_tiles, 1, 2) f32.
    """
    M, D = hidden_2d.shape
    if tile_m is None:
        # Double-buffered (tile_m, D) hidden tiles must fit comfortably inside
        # the smallest VMEM budget (v7x: 64 MiB physical / 32 MiB scoped).
        budget = 12 * 1024 * 1024
        tile_m = budget // (2 * D * hidden_2d.dtype.itemsize)
    tile_m = min(tile_m, _round_up(M, 16), 512)
    tile_m = max(16, (tile_m // 16) * 16)                       # (16,128)-friendly

    m_pad = _round_up(M, tile_m)
    if m_pad != M:
        hidden_2d = jnp.pad(hidden_2d, ((0, m_pad - M), (0, 0)))
        labels_2d = jnp.pad(labels_2d, ((0, m_pad - M), (0, 0)),
                            constant_values=IGNORE_INDEX)
    num_tiles = m_pad // tile_m

    scores, psums = pl.pallas_call(
        _biverifier_kernel,
        out_shape=(
            jax.ShapeDtypeStruct((m_pad, 2), jnp.float32),
            jax.ShapeDtypeStruct((num_tiles, 1, 2), jnp.float32),
        ),
        grid=(num_tiles,),
        in_specs=[
            pl.BlockSpec((2, 2), lambda i: (0, 0)),             # affine (resident)
            pl.BlockSpec((tile_m, D), lambda i: (i, 0)),        # hidden tiles
            pl.BlockSpec((D, 2), lambda i: (0, 0)),             # fused head weights
            pl.BlockSpec((tile_m, 2), lambda i: (i, 0)),        # label tiles
        ],
        out_specs=(
            pl.BlockSpec((tile_m, 2), lambda i: (i, 0)),        # fused scores
            pl.BlockSpec((1, 1, 2), lambda i: (i, 0, 0)),       # loss partials
        ),
        compiler_params=pltpu.CompilerParams(
            dimension_semantics=("parallel",),   # shard M tiles across TCs (v7x)
            vmem_limit_bytes=32 * 1024 * 1024,
        ),
    )(affine, hidden_2d, w_cat, labels_2d)
    return scores[:M], psums


# ----------------------------------------------------------------------------
# BiVerifier (JAX) — parameters + forward glue around the fused Pallas kernel.
# ----------------------------------------------------------------------------
class BiVerifierJax:
    def __init__(self, vocab_size, embed_dim, key, hidden_dtype=jnp.bfloat16):
        k_emb, k_og, k_ob, k_pg, k_pb = jax.random.split(key, 5)
        # TODO(synk): real transformer backbone forward (LLM) not implemented;
        # stand-in: bf16 embedding table (also used as the "output embeddings"
        # for init_head_params).
        self.embed_table = jax.random.normal(
            k_emb, (vocab_size, embed_dim), dtype=jnp.float32).astype(hidden_dtype)
        # nn.Parameter(torch.randn(1)) scalars
        self.outcome_gain = jax.random.normal(k_og, (1,), dtype=jnp.float32)
        self.outcome_bias = jax.random.normal(k_ob, (1,), dtype=jnp.float32)
        self.process_gain = jax.random.normal(k_pg, (1,), dtype=jnp.float32)
        self.process_bias = jax.random.normal(k_pb, (1,), dtype=jnp.float32)
        # init_head_params(): head weight = mean of output embeddings, (1, D).
        head_w = jnp.mean(self.embed_table.astype(jnp.float32), axis=0)        # (D,)
        # Both (bias-free) heads fused into a single (D, 2) weight.
        self.w_cat = jnp.stack([head_w, head_w], axis=-1).astype(hidden_dtype)  # (D, 2)
        # Folded affine:  (g*h + b) @ w == g*(h@w) + b*sum(w)
        colsum = jnp.sum(self.w_cat.astype(jnp.float32), axis=0)                # (2,)
        gains = jnp.concatenate([self.outcome_gain, self.process_gain])         # (2,)
        biases = jnp.concatenate([self.outcome_bias, self.process_bias])        # (2,)
        self.affine = jnp.stack([gains, biases * colsum], axis=0)               # (2, 2)

    def backbone_last_hidden(self, input_ids):
        # TODO(synk): stand-in for the LLM backbone forward (last_hidden_states).
        return self.embed_table[input_ids]                                      # (B,S,D)

    def forward(self, input_ids, outcome_labels=None, process_labels=None, *,
                tile_m=None):
        B, S = input_ids.shape
        h = self.backbone_last_hidden(input_ids)                                # (B,S,D) bf16
        D = h.shape[-1]
        M = B * S
        have_labels = outcome_labels is not None and process_labels is not None
        if have_labels:
            labels_2d = jnp.stack(
                [outcome_labels.astype(jnp.float32),
                 process_labels.astype(jnp.float32)], axis=-1).reshape(M, 2)
        else:
            labels_2d = jnp.full((M, 2), IGNORE_INDEX, dtype=jnp.float32)

        scores, psums = biverifier_heads_and_loss(
            h.reshape(M, D), self.w_cat, self.affine, labels_2d, tile_m=tile_m)

        outcome_v_scores = scores[:, 0].reshape(B, S, 1)
        process_v_scores = scores[:, 1].reshape(B, S, 1)

        loss = None
        if have_labels:
            sums = jnp.sum(psums, axis=(0, 1))                                  # (2,)
            outcome_loss = sums[0] / B   # mse_loss_with_mask divides by batch size
            process_loss = sums[1] / B
            # llm_loss omitted (corresponds to the labels=None path in PyTorch).
            loss = outcome_loss + process_loss
        return loss, outcome_v_scores, process_v_scores


if __name__ == "__main__":
    B, S, D, V = 2, 64, 128, 256
    key = jax.random.PRNGKey(0)
    k_model, k_ids, k_ol, k_pl_ = jax.random.split(key, 4)

    model = BiVerifierJax(vocab_size=V, embed_dim=D, key=k_model)

    input_ids = jax.random.randint(k_ids, (B, S), 0, V, dtype=jnp.int32)
    # labels in [0,1] with some IGNORE_INDEX positions (mask test)
    outcome_labels = jax.random.uniform(k_ol, (B, S), dtype=jnp.float32)
    outcome_labels = outcome_labels.at[:, :8].set(IGNORE_INDEX)
    process_labels = jax.random.uniform(k_pl_, (B, S), dtype=jnp.float32)
    process_labels = process_labels.at[:, -8:].set(IGNORE_INDEX)

    # tile_m=64 -> 2 grid tiles at this toy size (exercises the M pipeline).
    loss, o_scores, p_scores = model.forward(
        input_ids, outcome_labels=outcome_labels, process_labels=process_labels,
        tile_m=64)
    jax.block_until_ready((loss, o_scores, p_scores))

    # shape sanity
    assert o_scores.shape == (B, S, 1)
    assert p_scores.shape == (B, S, 1)
    assert loss.shape == ()

    # Pure-JAX reference (unfused affine, f32 math) for the head outputs.
    h32 = model.embed_table[input_ids].astype(jnp.float32)
    w32 = model.w_cat.astype(jnp.float32)
    oh = model.outcome_gain[0] * h32 + model.outcome_bias[0]
    ph = model.process_gain[0] * h32 + model.process_bias[0]
    o_ref = oh @ w32[:, 0:1]
    p_ref = ph @ w32[:, 1:2]
    assert jnp.allclose(o_ref, o_scores, atol=3e-2, rtol=3e-2), \
        float(jnp.max(jnp.abs(o_ref - o_scores)))
    assert jnp.allclose(p_ref, p_scores, atol=3e-2, rtol=3e-2), \
        float(jnp.max(jnp.abs(p_ref - p_scores)))

    # Reference for the fused masked-MSE loss (computed from the kernel scores,
    # so it isolates the in-kernel loss accumulation).
    def mse_ref(s, l):
        s = jnp.where(l != IGNORE_INDEX, s, 0.0)
        l = jnp.where(l != IGNORE_INDEX, l, 0.0)
        return jnp.sum((s - l) ** 2) / s.shape[0]

    loss_ref = (mse_ref(o_scores[..., 0], outcome_labels)
                + mse_ref(p_scores[..., 0], process_labels))
    assert jnp.allclose(loss, loss_ref, atol=1e-3, rtol=1e-3), \
        (float(loss), float(loss_ref))

    print("KERNEL_OK")
</pallas_src>

<mosaic_0001>
module attributes {stable_mosaic.version = 11 : i64} {
  func.func @_biverifier_kernel(%arg0: i32, %arg1: memref<2x2xf32, #tpu.memory_space<vmem>>, %arg2: memref<64x128xbf16, #tpu.memory_space<vmem>>, %arg3: memref<128x2xbf16, #tpu.memory_space<vmem>>, %arg4: memref<64x2xf32, #tpu.memory_space<vmem>>, %arg5: memref<64x2xf32, #tpu.memory_space<vmem>>, %arg6: memref<1x1x2xf32, #tpu.memory_space<vmem>>) attributes {dimension_semantics = [#tpu.dimension_semantics<parallel>], iteration_bounds = array<i64: 2>, scalar_prefetch = 0 : i64, scratch_operands = 0 : i64, tpu.core_type = #tpu.core_type<tc>, window_params = [{pipeline_mode = #tpu.pipeline_mode<synchronous>, transform_indices = @transform_0, window_bounds = array<i64: 2, 2>}, {transform_indices = @transform_1, window_bounds = array<i64: 64, 128>}, {pipeline_mode = #tpu.pipeline_mode<synchronous>, transform_indices = @transform_2, window_bounds = array<i64: 128, 2>}, {transform_indices = @transform_3, window_bounds = array<i64: 64, 2>}, {transform_indices = @transform_4, window_bounds = array<i64: 64, 2>}, {transform_indices = @transform_5, window_bounds = array<i64: 1, 1, 2>}]} {
    %c0 = arith.constant 0 : index
    %c0_0 = arith.constant 0 : index
    %0 = vector.load %arg2[%c0, %c0_0] : memref<64x128xbf16, #tpu.memory_space<vmem>>, vector<64x128xbf16>
    %c0_1 = arith.constant 0 : index
    %c0_2 = arith.constant 0 : index
    %1 = vector.load %arg3[%c0_1, %c0_2] : memref<128x2xbf16, #tpu.memory_space<vmem>>, vector<128x2xbf16>
    %cst = arith.constant dense<0.000000e+00> : vector<64x2xf32>
    %2 = tpu.matmul %0, %1, %cst {dimension_numbers = #tpu.dot_dimension_numbers<[1], [0], [0], [1], [0, 0, 1, 1], [], []>} : vector<64x128xbf16>, vector<128x2xbf16>, vector<64x2xf32> -> vector<64x2xf32>
    %c0_3 = arith.constant 0 : index
    %c0_4 = arith.constant 0 : index
    %3 = vector.load %arg1[%c0_3, %c0_4] : memref<2x2xf32, #tpu.memory_space<vmem>>, vector<1x2xf32>
    %4 = vector.broadcast %3 : vector<1x2xf32> to vector<64x2xf32>
    %5 = arith.mulf %2, %4 : vector<64x2xf32>
    %c1 = arith.constant 1 : index
    %c0_5 = arith.constant 0 : index
    %6 = vector.load %arg1[%c1, %c0_5] : memref<2x2xf32, #tpu.memory_space<vmem>>, vector<1x2xf32>
    %7 = vector.broadcast %6 : vector<1x2xf32> to vector<64x2xf32>
    %8 = arith.addf %5, %7 : vector<64x2xf32>
    %c0_6 = arith.constant 0 : index
    %c0_7 = arith.constant 0 : index
    %9 = vector.load %arg5[%c0_6, %c0_7] : memref<64x2xf32, #tpu.memory_space<vmem>>, vector<64x2xf32>
    tpu.vector_store %arg5[%c0_6, %c0_7], %8 {strides = array<i32>} : memref<64x2xf32, #tpu.memory_space<vmem>>, vector<64x2xf32>,
    %c0_8 = arith.constant 0 : index
    %c0_9 = arith.constant 0 : index
    %10 = vector.load %arg4[%c0_8, %c0_9] : memref<64x2xf32, #tpu.memory_space<vmem>>, vector<64x2xf32>
    %cst_10 = arith.constant -1.000000e+02 : f32
    %11 = vector.broadcast %cst_10 : f32 to vector<64x2xf32>
    %12 = arith.cmpf one, %10, %11 : vector<64x2xf32>
    %13 = arith.subf %8, %10 : vector<64x2xf32>
    %cst_11 = arith.constant 0.000000e+00 : f32
    %14 = vector.broadcast %cst_11 : f32 to vector<64x2xf32>
    %15 = arith.select %12, %13, %14 : vector<64x2xi1>, vector<64x2xf32>
    %16 = arith.mulf %15, %15 : vector<64x2xf32>
    %cst_12 = arith.constant dense<0.000000e+00> : vector<2xf32>
    %17 = vector.multi_reduction <add>, %16, %cst_12 [0] : vector<64x2xf32> to vector<2xf32>
    %18 = vector.shape_cast %17 : vector<2xf32> to vector<1x2xf32>
    %19 = vector.shape_cast %18 : vector<1x2xf32> to vector<1x1x2xf32>
    %c0_13 = arith.constant 0 : index
    %c0_14 = arith.constant 0 : index
    %c0_15 = arith.constant 0 : index
    %20 = vector.load %arg6[%c0_13, %c0_14, %c0_15] : memref<1x1x2xf32, #tpu.memory_space<vmem>>, vector<1x1x2xf32>
    tpu.vector_store %arg6[%c0_13, %c0_14, %c0_15], %19 {strides = array<i32>} : memref<1x1x2xf32, #tpu.memory_space<vmem>>, vector<1x1x2xf32>,
    return
  }
  func.func @transform_0(%arg0: i32) -> (i32, i32) {
    %c0_i32 = arith.constant 0 : i32
    %c0_i32_0 = arith.constant 0 : i32
    %c0_i32_1 = arith.constant 0 : i32
    return %c0_i32, %c0_i32_0 : i32, i32
  }
  func.func @transform_1(%arg0: i32) -> (i32, i32) {
    %c0_i32 = arith.constant 0 : i32
    %c0_i32_0 = arith.constant 0 : i32
    return %arg0, %c0_i32 : i32, i32
  }
  func.func @transform_2(%arg0: i32) -> (i32, i32) {
    %c0_i32 = arith.constant 0 : i32
    %c0_i32_0 = arith.constant 0 : i32
    %c0_i32_1 = arith.constant 0 : i32
    return %c0_i32, %c0_i32_0 : i32, i32
  }
  func.func @transform_3(%arg0: i32) -> (i32, i32) {
    %c0_i32 = arith.constant 0 : i32
    %c0_i32_0 = arith.constant 0 : i32
    return %arg0, %c0_i32 : i32, i32
  }
  func.func @transform_4(%arg0: i32) -> (i32, i32) {
    %c0_i32 = arith.constant 0 : i32
    %c0_i32_0 = arith.constant 0 : i32
    return %arg0, %c0_i32 : i32, i32
  }
  func.func @transform_5(%arg0: i32) -> (i32, i32, i32) {
    %c0_i32 = arith.constant 0 : i32
    %c0_i32_0 = arith.constant 0 : i32
    %c0_i32_1 = arith.constant 0 : i32
    return %arg0, %c0_i32, %c0_i32_0 : i32, i32, i32
  }
}

</mosaic_0001>

<bundles_post_ra>
// kernel: tpu_custom_call.1
= control target key start
LH: loop header
LB: loop body
LE: loop exit
PB: predicated region body
PF: predicated region fallthrough
CT: control target
= control target key end

     0   :  { %11 = vsyncpa [#allocation3], 0  ;;  %s1047_s0 = inlined_call_operand.vmem [shape: f32[2,2], index: 0, kind: input, shape index: {}]   ;;  %s1048_s1 = inlined_call_operand.vmem [shape: bf16[128,128], index: 1, kind: input, shape index: {}]   ;;  %s1049_s2 = inlined_call_operand.vmem [shape: bf16[128,2], index: 2, kind: input, shape index: {}]   ;;  %s1050_s3 = inlined_call_operand.vmem [shape: f32[128,2], index: 3, kind: input, shape index: {}]   ;;  %s1051_s4 = inlined_call_operand.vmem [shape: f32[128,2], index: 4, kind: output, shape index: {0}]   ;;  %s1052_s5 = inlined_call_operand.hbm [shape: f32[2,1,2], index: 5, kind: output, shape index: {1}]  }
   0x1   :  { %13 = vsyncpa [#allocation3 + $0x1], 0  ;;  %s859_s18 = smov 0   ;;  %s861_s19 = smov 0  }
   0x2   :  { %s863_s20 = smov 0   ;;  %s865_s21 = smov 0  }
   0x3 LB: > { %s880_s22 = sadd.s32 4294967295, %s826_s21   ;;  %s634_s23 = sadd.s32 4294967294, %s826_s21   ;;  %s826_s21 = sphi %s865_s21, %s1058_s21   ;;  %s822_s20 = sphi %s863_s20, %s1057_s20   ;;  %s818_s19 = sphi %s861_s19, %s1056_s19   ;;  %s814_s18 = sphi %s859_s18, %s1055_s18  }
   0x4   : > { %s884_s24 = sadd.s32 1, %s826_s21   ;;  %s146_s25 = sadd.s32 1, %s822_s20 }
   0x5   : > { %s143_s26 = ssub.s32 %s826_s21, %s884_s24  ;;  %p156_p0 = scmp.ne.s32.totalorder %s822_s20, %s818_s19 }
   0x6   : > { %p144_p1 = scmp.eq.s32.totalorder %s143_s26, 0  ;;  %p157_p2 = scmp.eq.s32.totalorder %s880_s22, 1 }
   0x7   : > { %p162_p3 = scmp.ne.s32.totalorder %s818_s19, %s814_s18  ;;  %p163_p4 = scmp.eq.s32.totalorder %s634_s23, 1 }
   0x8   : > { %s895_s27 = scalar_select %p144_p1, %s822_s20, %s146_s25  }
   0x9   : > { %p897_p5 = por %p157_p2, %p156_p0  ;;  %p901_p6 = por %p163_p4, %p162_p3 }
   0xa   : > { %p637_p7 = scmp.ge.s32.totalorder %s826_s21, 1  ;;  %p205_p8 = scmp.lt.s32.totalorder %s826_s21, 3 }
   0xc   : > { %p206_p9 = pnand %p637_p7, %p205_p8 }
   0xd   : > { %v752_v0 = vld [vmem:[%s1049_s2] sm:$0xff] (!%p206_p9)   ;;  %s638_s7 = sshll.u32 (!%p206_p9), %s880_s22, 3  ;;  %v753_v1 = vld [vmem:[%s1049_s2 + $0x8] sm:$0xff] (!%p206_p9)   ;;  %v754_v2 = vld [vmem:[%s1049_s2 + $0x10] sm:$0xff] (!%p206_p9)   ;;  %vm448_vm0 = vcmask (!%p206_p9), 15360   ;;  %s240_s30 = sand.u32 (!%p206_p9), 1, %s818_s19  }
   0xe   : > { %209 = sbr.rel (%p206_p9) target bundleno = 311 (0x137), region = 36  ;;  %p243_p10 = scmp.lt.s32.totalorder (!%p206_p9), %s638_s7, 15  ;;  %673 = vmatprep.subr.bf16.mxu0 (!%p206_p9), %v752_v0  ;;  %697 = vmatprep.subr.bf16.mxu1 (!%p206_p9), %v752_v0  ;;  %v755_v3 = vld [vmem:[%s1049_s2 + $0x18] sm:$0xff] (!%p206_p9)   ;;  %v756_v6 = vld [vmem:[%s1049_s2 + $0x20] sm:$0xff] (!%p206_p9)   ;;  %v757_v7 = vld [vmem:[%s1049_s2 + $0x28] sm:$0xff] (!%p206_p9)   ;;  %vm518_vm9 = vcmask (!%p206_p9), 8192  }
   0xf   : > { %674 = vmatpush3.bf16.msra.mxu0 (!%p206_p9), %v752_v0  ;;  %705 = vmatpush3.bf16.msra.mxu1 (!%p206_p9), %v752_v0  ;;  %v758_v8 = vld [vmem:[%s1049_s2 + $0x30] sm:$0xff] (!%p206_p9)   ;;  %v759_v9 = vld [vmem:[%s1049_s2 + $0x38] sm:$0xff] (!%p206_p9)   ;;  %v656_v15 = vld [vmem:[%s1047_s0] ss:$0 sm:$0xff] (!%p206_p9)  ;;  %s658_s6 = sshll.u32 (!%p206_p9), %s880_s22, 4  ;;  %s241_s8 = scalar_lea.vmem (!%p206_p9), [#allocation2], %s240_s30 }
  0x10   : > { %675 = vmatprep.subr.bf16.mxu0 (!%p206_p9), %v753_v1  ;;  %698 = vmatprep.subr.bf16.mxu1 (!%p206_p9), %v753_v1  ;;  %v657_v18 = vld [vmem:[%s1047_s0 + $0x1] ss:$0 sm:$0xff] (!%p206_p9)  ;;  %s542_s9 = sshll.u32 (!%p206_p9), %s241_s8, 4  ;;  %s526_s13 = scalar_lea.sflag (!%p206_p9), [#allocation3], %s240_s30  ;;  %s1007_s9 = int_to_ptr.vmem [resolvable:$true] %s542_s9 }
  0x11   : > { %s828_s22 = smov (!%p206_p9), [#allocation2]  }
  0x13   : > { %676 = vmatpush3.bf16.msra.mxu0 (!%p206_p9), %v753_v1  ;;  %706 = vmatpush3.bf16.msra.mxu1 (!%p206_p9), %v753_v1 }
  0x14   : > { %677 = vmatprep.subr.bf16.mxu0 (!%p206_p9), %v754_v2  ;;  %699 = vmatprep.subr.bf16.mxu1 (!%p206_p9), %v754_v2 }
  0x15   : > { %s1060_s7 = smov (!%p243_p10, %s638_s7), 15 }
  0x16   : > { %s639_s12 = sshll.u32 %s1060_s7, 2  ;;  %s641_s11 = sshll.u32 %s1060_s7, 3 }
  0x17   : > { %s923_s15 = scalar_lea.vmem %s1048_s1, %s639_s12  ;;  %678 = vmatpush3.bf16.msra.mxu0 %v754_v2  ;;  %707 = vmatpush3.bf16.msra.mxu1 %v754_v2  ;;  %s948_s14 = scalar_lea.vmem %s1050_s3, %s641_s11 }
  0x18   : > { %v760_v4 = vld [vmem:[%s923_s15] sm:$0xff]   ;;  %v762_v5 = vld [vmem:[%s923_s15 + $0x10] sm:$0xff]   ;;  %679 = vmatprep.subr.bf16.mxu0 %v755_v3  ;;  %700 = vmatprep.subr.bf16.mxu1 %v755_v3  ;;  %v761_v10 = vld [vmem:[%s923_s15 + $0x8] sm:$0xff]   ;;  %s966_s26 = scalar_lea.vmem %s1051_s4, %s641_s11  ;;  %s1005_s12 = scalar_lea.hbm %s1052_s5, %s658_s6 }
  0x19   : > { %689 = vmatprep.mubr.bf16.mxu0 %v760_v4  ;;  %693 = vmatprep.mubr.bf16.mxu1 %v762_v5  ;;  %v763_v11 = vld [vmem:[%s923_s15 + $0x18] sm:$0xff]   ;;  %v459_v12 = vld [vmem:[%s948_s14 + $0x10] sm:$0xff]  ;;  %v457_v13 = vld [vmem:[%s948_s14] sm:$0xff]  ;;  %s768_s15 = sshll.u32 %s828_s22, 4  ;;  %s769_s15 = int_to_ptr.vmem [resolvable:$false] %s768_s15 }
  0x1a   : > { %v460_v14 = vld [vmem:[%s948_s14 + $0x18] sm:$0xff]  ;;  %v458_v16 = vld [vmem:[%s948_s14 + $0x8] sm:$0xff]  ;;  %v463_v17 = vld [vmem:[%s948_s14 + $0x30] sm:$0xff]  ;;  %vm467_vm1 = vcmp.ne.f32.partialorder %v459_v12, -100.0  ;;  %vm465_vm2 = vcmp.ne.f32.partialorder %v457_v13, -100.0  ;;  %s770_s16 = scalar_lea.vmem %s769_s15, 32  ;;  %p771_p0 = scmp.lt.s32.totalorder %s1007_s9, %s769_s15 }
  0x1b   : > { %680 = vmatpush3.bf16.msra.mxu0 %v755_v3  ;;  %708 = vmatpush3.bf16.msra.mxu1 %v755_v3  ;;  %v461_v19 = vld [vmem:[%s948_s14 + $0x20] sm:$0xff]  ;;  %v464_v20 = vld [vmem:[%s948_s14 + $0x38] sm:$0xff]  ;;  %vm468_vm3 = vcmp.ne.f32.partialorder %v460_v14, -100.0  ;;  %vm466_vm4 = vcmp.ne.f32.partialorder %v458_v16, -100.0  ;;  %vm471_vm5 = vcmp.ne.f32.partialorder %v463_v17, -100.0  ;;  %v462_v55 = vld [vmem:[%s948_s14 + $0x28] sm:$0xff] }
  0x1c   : > { %681 = vmatprep.subr.bf16.mxu0 %v756_v6  ;;  %701 = vmatprep.subr.bf16.mxu1 %v756_v6  ;;  %vm469_vm6 = vcmp.ne.f32.partialorder %v461_v19, -100.0  ;;  %vm472_vm7 = vcmp.ne.f32.partialorder %v464_v20, -100.0  ;;  %vm470_vm8 = vcmp.ne.f32.partialorder %v462_v55, -100.0  ;;  %s764_s14 = scalar_lea.vmem %s1007_s9, 16 }
  0x1d   : > { %p765_p11 = scmp.ne.s32.totalorder %s1007_s9, %s764_s14  ;;  %p772_p1 = scmp.lt.s32.totalorder %s770_s16, %s764_s14 }
  0x1f   : > { %682 = vmatpush3.bf16.msra.mxu0 %v756_v6  ;;  %709 = vmatpush3.bf16.msra.mxu1 %v756_v6  ;;  %p766_p12 = pnand %p765_p11, %p897_p5  ;;  %p773_p2 = por %p772_p1, %p771_p0 }
  0x20   : > { %683 = vmatprep.subr.bf16.mxu0 %v757_v7  ;;  %702 = vmatprep.subr.bf16.mxu1 %v757_v7 }
  0x21   : > { %p767_p13 = pneg %p766_p12 }
  0x23   : > { %684 = vmatpush3.bf16.msra.mxu0 %v757_v7  ;;  %710 = vmatpush3.bf16.msra.mxu1 %v757_v7  ;;  %p774_p3 = pnand %p773_p2, %p767_p13 }
  0x24   : > { %685 = vmatprep.subr.bf16.mxu0 %v758_v8  ;;  %703 = vmatprep.subr.bf16.mxu1 %v758_v8 }
  0x27   : > { %686 = vmatpush3.bf16.msra.mxu0 %v758_v8  ;;  %711 = vmatpush3.bf16.msra.mxu1 %v758_v8 }
  0x28   : > { %687 = vmatprep.subr.bf16.mxu0 %v759_v9  ;;  %704 = vmatprep.subr.bf16.mxu1 %v759_v9 }
  0x2b   : > { %688 = vmatpush3.bf16.msra.mxu0 %v759_v9  ;;  %712 = vmatpush3.bf16.msra.mxu1 %v759_v9 }
  0x2e   : > { %690 = vmatmul.mubr.bf16.vlgmr.msra.gmra.mrb[0].mxu0 %v761_v10  ;;  %694 = vmatmul.mubr.bf16.vlgmr.msra.gmra.mrb[0].mxu1 %v763_v11 }
 0x101   : > { %v691_v21 = vpop.f32.mrb[0].mxu0  ;;  %v695_v22 = vpop.f32.mrb[0].mxu1 }
 0x102   : > { %v429_v23 = vmul.f32 %v691_v21, %v656_v15  ;;  %v391_v24 = vpop.f32.mrb[1].mxu0  ;;  %v433_v25 = vmul.f32 %v695_v22, %v656_v15  ;;  %v407_v26 = vpop.f32.mrb[1].mxu1 }
 0x103   : > { %v427_v27 = vmul.f32 %v656_v15, %v391_v24  ;;  %v692_v28 = vpop.f32.mrb[2].mxu0  ;;  %v431_v29 = vmul.f32 %v656_v15, %v407_v26  ;;  %v696_v30 = vpop.f32.mrb[2].mxu1 }
 0x104   : > { %v442_v31 = vadd.f32 %v657_v18, %v429_v23  ;;  %v430_v32 = vmul.f32 %v692_v28, %v656_v15  ;;  %v394_v33 = vpop.f32.mrb[3].mxu0  ;;  %v446_v34 = vadd.f32 %v657_v18, %v433_v25  ;;  %v434_v35 = vmul.f32 %v696_v30, %v656_v15  ;;  %v410_v36 = vpop.f32.mrb[3].mxu1 }
 0x105   : > { %v440_v37 = vadd.f32 %v657_v18, %v427_v27  ;;  %v428_v38 = vmul.f32 %v656_v15, %v394_v33  ;;  %v444_v39 = vadd.f32 %v657_v18, %v431_v29  ;;  %v432_v40 = vmul.f32 %v656_v15, %v410_v36 }
 0x106   : > { %451 = vst.msk [vmem:[%s966_s26 + $0x10] sm:$0xff] %vm448_vm0, %v442_v31  ;;  %v475_v41 = vsub.f32 %v442_v31, %v459_v12  ;;  %v443_v42 = vadd.f32 %v657_v18, %v430_v32  ;;  %455 = vst.msk [vmem:[%s966_s26 + $0x30] sm:$0xff] %vm448_vm0, %v446_v34  ;;  %v479_v43 = vsub.f32 %v446_v34, %v463_v17 }
 0x107   : > { %v447_v44 = vadd.f32 %v657_v18, %v434_v35  ;;  %449 = vst.msk [vmem:[%s966_s26] sm:$0xff] %vm448_vm0, %v440_v37  ;;  %v473_v45 = vsub.f32 %v440_v37, %v457_v13  ;;  %v441_v46 = vadd.f32 %v657_v18, %v428_v38  ;;  %453 = vst.msk [vmem:[%s966_s26 + $0x20] sm:$0xff] %vm448_vm0, %v444_v39 }
 0x108   : > { %v477_v47 = vsub.f32 %v444_v39, %v461_v19  ;;  %v445_v48 = vadd.f32 %v657_v18, %v432_v40  ;;  %v483_v49 = vsel %vm467_vm1, %v475_v41, 0.0  ;;  %452 = vst.msk [vmem:[%s966_s26 + $0x18] sm:$0xff] %vm448_vm0, %v443_v42  ;;  %v476_v50 = vsub.f32 %v443_v42, %v460_v14 }
 0x109   : > { %v487_v51 = vsel %vm471_vm5, %v479_v43, 0.0  ;;  %456 = vst.msk [vmem:[%s966_s26 + $0x38] sm:$0xff] %vm448_vm0, %v447_v44  ;;  %v480_v52 = vsub.f32 %v447_v44, %v464_v20  ;;  %v481_v53 = vsel %vm465_vm2, %v473_v45, 0.0  ;;  %450 = vst.msk [vmem:[%s966_s26 + $0x8] sm:$0xff] %vm448_vm0, %v441_v46  ;;  %v474_v54 = vsub.f32 %v441_v46, %v458_v16 }
 0x10a   : > { %454 = vst.msk [vmem:[%s966_s26 + $0x28] sm:$0xff] %vm448_vm0, %v445_v48  ;;  %v489_v56 = vmul.f32 %v481_v53, %v481_v53  ;;  %v484_v57 = vsel %vm468_vm3, %v476_v50, 0.0  ;;  %v485_v58 = vsel %vm469_vm6, %v477_v47, 0.0  ;;  %v491_v61 = vmul.f32 %v483_v49, %v483_v49 }
 0x10b   : > { %v488_v59 = vsel %vm472_vm7, %v480_v52, 0.0  ;;  %v482_v60 = vsel %vm466_vm4, %v474_v54, 0.0  ;;  %v478_v63 = vsub.f32 %v445_v48, %v462_v55  ;;  %v492_v1 = vmul.f32 %v484_v57, %v484_v57 }
 0x10c   : > { %v490_v62 = vmul.f32 %v482_v60, %v482_v60  ;;  %v497_v0 = vsel %vm448_vm0, %v489_v56, 0.0  ;;  %v493_v3 = vmul.f32 %v485_v58, %v485_v58  ;;  %v500_v6 = vsel %vm448_vm0, %v491_v61, 0.0 }
 0x10d   : > { %v486_v5 = vsel %vm470_vm8, %v478_v63, 0.0  ;;  %v502_v8 = vsel %vm448_vm0, %v492_v1, 0.0  ;;  %v495_v12 = vmul.f32 %v487_v51, %v487_v51  ;;  %v496_v14 = vmul.f32 %v488_v59, %v488_v59 }
 0x10e   : > { %v498_v2 = vsel %vm448_vm0, %v490_v62, 0.0  ;;  %v504_v9 = vsel %vm448_vm0, %v493_v3, 0.0  ;;  %v494_v10 = vmul.f32 %v486_v5, %v486_v5 }
 0x10f   : > { %v499_v4 = vadd.f32 %v498_v2, %v497_v0  ;;  %v508_v17 = vsel %vm448_vm0, %v495_v12, 0.0  ;;  %v510_v19 = vsel %vm448_vm0, %v496_v14, 0.0 }
 0x110   : > { %v506_v15 = vsel %vm448_vm0, %v494_v10, 0.0 }
 0x111   : > { %v501_v7 = vadd.f32 %v500_v6, %v499_v4 }
 0x113   : > { %v503_v11 = vadd.f32 %v502_v8, %v501_v7 }
 0x115   : > { %v505_v13 = vadd.f32 %v504_v9, %v503_v11 }
 0x117   : > { %v507_v16 = vadd.f32 %v506_v15, %v505_v13 }
 0x119   : > { %v509_v18 = vadd.f32 %v508_v17, %v507_v16 }
 0x11b   : > { %v511_v20 = vadd.f32 %v510_v19, %v509_v18 }
 0x11d   : > { %v512_v21 = vrot.slane %v511_v20, 4 }
 0x11f   : > { %v513_v22 = vadd.f32 %v512_v21, %v511_v20 }
 0x121   : > { %v514_v23 = vrot.slane %v513_v22, 2 }
 0x123   : > { %v515_v24 = vadd.f32 %v514_v23, %v513_v22 }
 0x125   : > { %v516_v25 = vrot.slane %v515_v24, 1 }
 0x127   : > { %v517_v26 = vadd.f32 %v516_v25, %v515_v24 }
 0x129   : > { %519 = vst.msk [vmem:[%s241_s8] sm:$0x1] %vm518_vm9, %v517_v26 }
 0x12a   : > { %777 = shalt.err (!%p774_p3)
}
 0x12b   : > { %s778_s7 = scalar_lea.hbm %s1005_s12, 16  ;;  %s782_s25 = scalar_lea.hbm %s1052_s5, 32 }
 0x12c   : > { %p779_p4 = scmp.ne.s32.totalorder %s1005_s12, %s778_s7  ;;  %p783_p9 = scmp.lt.u32.totalorder %s1005_s12, %s1052_s5 }
 0x12d   : > { %p784_p10 = scmp.lt.u32.totalorder %s782_s25, %s778_s7  ;;  %p786_p12 = scmp.lt.u32.totalorder %s778_s7, %s1005_s12 }
 0x12e   : > { %p780_p7 = pnand %p779_p4, %p897_p5 }
 0x12f   : > { %p785_p11 = por %p784_p10, %p783_p9 }
 0x130   : > { %p781_p8 = pneg %p780_p7 }
 0x131   : > { %p787_p13 = por %p786_p12, %p785_p11 }
 0x133   : > { %p788_p0 = pnand %p787_p13, %p781_p8 }
 0x135   : > { %791 = shalt.err (!%p788_p0)
}
 0x136   : > { %713 = dma.vmem_to_hbm [thread:$0]  (%p897_p5), %s1007_s9, 16, %s1005_s12, %s526_s13  }
 0x137 PF: > { %p719_p1 = scmp.ge.s32.totalorder %s826_s21, 2  ;;  %s562_s6 = sand.u32 1, %s814_s18  }
 0x138   : > { %s563_s8 = scalar_lea.sflag [#allocation3], %s562_s6 }
 0x139   : > { %p716_p2 = pnand %p719_p1, %p901_p6 }
 0x13b   : > { %809 = dma.done.wait (!%p716_p2), %s563_s8, 16  }
 0x13c   : > { %811 = vsyncadd (!%p716_p2), %s563_s8, 4294967280  ;;  %p16_p3 = scmp.ge.s32.totalorder %s884_s24, 4   ;;  %s1055_s18 = smov %s818_s19 }
 0x13d   : > { %s1056_s19 = smov %s822_s20  ;;  %s1057_s20 = smov %s895_s27 }
 0x13e   : > { %s1058_s21 = smov %s884_s24  ;;  %18 = sbr.rel (!%p16_p3) target bundleno = 3 (0x3), region = 86 }
 0x145   :  { %567 = vsyncpa [#allocation3], 1 }
 0x146   :  { %569 = vsyncpa [#allocation3 + $0x1], 1 }

</bundles_post_ra>
